<compile_context>
chip_gen: v7x
topology: tpu7x:2x2x1
jax: 0.10.0
libtpu: 0.0.40
codegen_flags: <defaults>
</compile_context>

<pallas_src>
import math

import jax
import jax.numpy as jnp
from jax.experimental import pallas as pl
from jax.experimental.pallas import tpu as pltpu

EPS = 1e-5          # nn.BatchNorm1d default eps
NEG_PAD = -1e30     # logit value for padded (non-existent) classes -> softmax == 0


def _make_domain_cls_kernel(ncls):
    """Fused fc1 -> BN(train) -> ReLU -> fc2 -> softmax -> CE(on probs) kernel."""

    def kernel(x_ref, w1_ref, b1_ref, g_ref, beta_ref, w2_ref, b2_ref,
               onehot_ref, probs_ref, loss_ref):
        # fc1: bf16 x bf16 -> f32 on the MXU (x cast in-kernel; no wrapper-side cast op).
        x = x_ref[...].astype(jnp.bfloat16)
        h = jnp.dot(x, w1_ref[...], preferred_element_type=jnp.float32) + b1_ref[...]

        # BatchNorm1d, training mode: per-feature batch stats, biased variance.
        # Batch axis is never tiled, so these are the exact global statistics.
        mean = jnp.mean(h, axis=0, keepdims=True)
        var = jnp.mean((h - mean) ** 2, axis=0, keepdims=True)
        h = (h - mean) * jax.lax.rsqrt(var + EPS)
        h = h * g_ref[...] + beta_ref[...]

        # ReLU.
        h = jnp.maximum(h, 0.0)

        # fc2 (zero-padded hidden rows of w2 contribute nothing; padded class
        # columns get logit NEG_PAD from b2 -> softmax prob exactly 0).
        logits = jnp.dot(h.astype(jnp.bfloat16), w2_ref[...],
                         preferred_element_type=jnp.float32) + b2_ref[...]

        # Softmax over the (lane-padded) class axis; lane-dense (B, 128) store.
        m = jnp.max(logits, axis=-1, keepdims=True)
        e = jnp.exp(logits - m)
        p = e / jnp.sum(e, axis=-1, keepdims=True)
        probs_ref[...] = p

        # Fused CrossEntropyLoss applied -- as in the PyTorch module -- to the
        # *softmax outputs* (i.e. it log-softmaxes the probabilities again).
        # Restrict the log-sum-exp to the real (unpadded) classes.
        lane = jax.lax.broadcasted_iota(jnp.int32, p.shape, 1)
        valid = lane < ncls
        m2 = jnp.max(jnp.where(valid, p, NEG_PAD), axis=-1, keepdims=True)
        e2 = jnp.where(valid, jnp.exp(p - m2), 0.0)
        lse = m2 + jnp.log(jnp.sum(e2, axis=-1, keepdims=True))      # (B, 1)
        picked = jnp.sum(p * onehot_ref[...], axis=-1, keepdims=True)  # (B, 1)
        loss_ref[...] = jnp.mean(lse - picked, axis=0, keepdims=True)  # (1, 1)

    return kernel


def _round_up(n, m):
    return ((n + m - 1) // m) * m


def prepare_domain_cls_params(w1, b1, gamma, beta, w2, b2):
    """One-time (per parameter update) padding / casting of the module parameters.

    w1: (512, 100) = fc.weight.T    b1: (100,)
    gamma/beta: (100,)              w2: (100, 2) = fc2.weight.T    b2: (2,)
    """
    hid = w1.shape[1]
    ncls = w2.shape[1]
    hid_pad = _round_up(hid, 128)
    ncls_pad = _round_up(ncls, 128)

    f32, bf16 = jnp.float32, jnp.bfloat16
    w1_p = jnp.pad(w1.astype(bf16), ((0, 0), (0, hid_pad - hid)))
    b1_p = jnp.pad(b1.astype(f32), (0, hid_pad - hid)).reshape(1, hid_pad)
    g_p = jnp.pad(gamma.astype(f32), (0, hid_pad - hid)).reshape(1, hid_pad)
    be_p = jnp.pad(beta.astype(f32), (0, hid_pad - hid)).reshape(1, hid_pad)
    w2_p = jnp.pad(w2.astype(bf16), ((0, hid_pad - hid), (0, ncls_pad - ncls)))
    b2_p = jnp.pad(b2.astype(f32), (0, ncls_pad - ncls),
                   constant_values=NEG_PAD).reshape(1, ncls_pad)
    return dict(w1=w1_p, b1=b1_p, gamma=g_p, beta=be_p, w2=w2_p, b2=b2_p,
                ncls=ncls, ncls_pad=ncls_pad)


def domain_cls_forward(x, params, domain_label=None, epoch=0):
    """Forward of Domain_Cls(GradRL=True). x: (B, 512) f32."""
    # GRL is identity in the forward pass; lambda only scales the backward gradient.
    # TODO(synk): gradient reversal (backward-only) and BatchNorm running-stat buffer
    # updates are not reproduced; they do not affect the returned tensors.
    _ = 2.0 / (1.0 + math.exp(-(epoch / 400.0))) - 1.0

    b = x.shape[0]
    ncls = params["ncls"]
    ncls_pad = params["ncls_pad"]

    if domain_label is None:
        onehot = jnp.zeros((b, ncls_pad), jnp.float32)
    else:
        onehot = jax.nn.one_hot(domain_label.astype(jnp.int32), ncls_pad,
                                dtype=jnp.float32)

    probs_pad, loss = pl.pallas_call(
        _make_domain_cls_kernel(ncls),
        out_shape=(jax.ShapeDtypeStruct((b, ncls_pad), jnp.float32),
                   jax.ShapeDtypeStruct((1, 1), jnp.float32)),
    )(x, params["w1"], params["b1"], params["gamma"], params["beta"],
      params["w2"], params["b2"], onehot)

    probs = probs_pad[:, :ncls]
    if domain_label is None:
        return probs
    return probs, loss[0, 0]


def _reference(x, w1, b1, gamma, beta, w2, b2, labels):
    """Plain-JAX f32 reference mirroring the PyTorch forward (training-mode BN)."""
    hi = jax.lax.Precision.HIGHEST
    out = jnp.dot(x, w1, precision=hi) + b1
    mean = out.mean(axis=0, keepdims=True)
    var = ((out - mean) ** 2).mean(axis=0, keepdims=True)
    out = (out - mean) / jnp.sqrt(var + EPS) * gamma + beta
    out = jnp.maximum(out, 0.0)
    logits = jnp.dot(out, w2, precision=hi) + b2
    probs = jax.nn.softmax(logits, axis=1)
    # CrossEntropyLoss applied to the softmax outputs (as in the module).
    lse = jnp.log(jnp.sum(jnp.exp(probs), axis=1))
    loss = jnp.mean(lse - probs[jnp.arange(x.shape[0]), labels])
    return probs, loss


if __name__ == "__main__":
    B, IN, HID, NCLS = 8, 512, 100, 2
    key = jax.random.PRNGKey(0)
    kx, kw1, kb1, kw2, kb2, kl = jax.random.split(key, 6)

    x = jax.random.normal(kx, (B, IN), jnp.float32)

    # nn.Linear default init: U(-1/sqrt(fan_in), 1/sqrt(fan_in)); BN weight=1, bias=0.
    bound1 = 1.0 / math.sqrt(IN)
    w1 = jax.random.uniform(kw1, (IN, HID), jnp.float32, -bound1, bound1)
    b1 = jax.random.uniform(kb1, (HID,), jnp.float32, -bound1, bound1)
    bound2 = 1.0 / math.sqrt(HID)
    w2 = jax.random.uniform(kw2, (HID, NCLS), jnp.float32, -bound2, bound2)
    b2 = jax.random.uniform(kb2, (NCLS,), jnp.float32, -bound2, bound2)
    gamma = jnp.ones((HID,), jnp.float32)
    beta = jnp.zeros((HID,), jnp.float32)
    labels = jax.random.randint(kl, (B,), 0, NCLS)

    # One-time parameter prep (hoisted out of the per-forward hot path).
    params = prepare_domain_cls_params(w1, b1, gamma, beta, w2, b2)

    probs, loss = domain_cls_forward(x, params, domain_label=labels, epoch=0)
    probs, loss = jax.block_until_ready((probs, loss))

    ref_probs, ref_loss = _reference(x, w1, b1, gamma, beta, w2, b2, labels)
    assert probs.shape == (B, NCLS), probs.shape
    assert jnp.allclose(jnp.sum(probs, axis=1), 1.0, atol=1e-5)
    # bf16 MXU inputs (f32 accumulation) vs f32 HIGHEST reference.
    assert jnp.allclose(probs, ref_probs, atol=1e-2, rtol=1e-2), \
        float(jnp.max(jnp.abs(probs - ref_probs)))
    assert jnp.allclose(loss, ref_loss, atol=1e-2, rtol=1e-2), \
        float(jnp.abs(loss - ref_loss))

    # Also exercise the label-less path (module returns only the softmax output).
    probs_only = jax.block_until_ready(domain_cls_forward(x, params, None, epoch=3))
    assert jnp.allclose(probs_only, probs, atol=1e-6)

    print("KERNEL_OK")
</pallas_src>

<mosaic_0001>
module attributes {stable_mosaic.version = 11 : i64} {
  func.func @kernel(%arg0: memref<8x512xf32, #tpu.memory_space<vmem>>, %arg1: memref<512x128xbf16, #tpu.memory_space<vmem>>, %arg2: memref<1x128xf32, #tpu.memory_space<vmem>>, %arg3: memref<1x128xf32, #tpu.memory_space<vmem>>, %arg4: memref<1x128xf32, #tpu.memory_space<vmem>>, %arg5: memref<128x128xbf16, #tpu.memory_space<vmem>>, %arg6: memref<1x128xf32, #tpu.memory_space<vmem>>, %arg7: memref<8x128xf32, #tpu.memory_space<vmem>>, %arg8: memref<8x128xf32, #tpu.memory_space<vmem>>, %arg9: memref<1x1xf32, #tpu.memory_space<vmem>>) attributes {dimension_semantics = [], scalar_prefetch = 0 : i64, scratch_operands = 0 : i64, tpu.core_type = #tpu.core_type<tc>} {
    %c0 = arith.constant 0 : index
    %c0_0 = arith.constant 0 : index
    %0 = vector.load %arg0[%c0, %c0_0] : memref<8x512xf32, #tpu.memory_space<vmem>>, vector<8x512xf32>
    %1 = arith.truncf %0 : vector<8x512xf32> to vector<8x512xbf16>
    %c0_1 = arith.constant 0 : index
    %c0_2 = arith.constant 0 : index
    %2 = vector.load %arg1[%c0_1, %c0_2] : memref<512x128xbf16, #tpu.memory_space<vmem>>, vector<512x128xbf16>
    %cst = arith.constant dense<0.000000e+00> : vector<8x128xf32>
    %3 = tpu.matmul %1, %2, %cst {dimension_numbers = #tpu.dot_dimension_numbers<[1], [0], [0], [1], [0, 0, 1, 1], [], []>} : vector<8x512xbf16>, vector<512x128xbf16>, vector<8x128xf32> -> vector<8x128xf32>
    %c0_3 = arith.constant 0 : index
    %c0_4 = arith.constant 0 : index
    %4 = vector.load %arg2[%c0_3, %c0_4] : memref<1x128xf32, #tpu.memory_space<vmem>>, vector<1x128xf32>
    %5 = vector.broadcast %4 : vector<1x128xf32> to vector<8x128xf32>
    %6 = arith.addf %3, %5 : vector<8x128xf32>
    %cst_5 = arith.constant dense<0.000000e+00> : vector<128xf32>
    %7 = vector.multi_reduction <add>, %6, %cst_5 [0] : vector<8x128xf32> to vector<128xf32>
    %8 = vector.shape_cast %7 : vector<128xf32> to vector<1x128xf32>
    %cst_6 = arith.constant 8.000000e+00 : f32
    %9 = vector.broadcast %cst_6 : f32 to vector<1x128xf32>
    %10 = arith.divf %8, %9 : vector<1x128xf32>
    %11 = vector.broadcast %10 : vector<1x128xf32> to vector<8x128xf32>
    %12 = arith.subf %6, %11 : vector<8x128xf32>
    %13 = arith.mulf %12, %12 : vector<8x128xf32>
    %cst_7 = arith.constant dense<0.000000e+00> : vector<128xf32>
    %14 = vector.multi_reduction <add>, %13, %cst_7 [0] : vector<8x128xf32> to vector<128xf32>
    %15 = vector.shape_cast %14 : vector<128xf32> to vector<1x128xf32>
    %cst_8 = arith.constant 8.000000e+00 : f32
    %16 = vector.broadcast %cst_8 : f32 to vector<1x128xf32>
    %17 = arith.divf %15, %16 : vector<1x128xf32>
    %18 = vector.broadcast %10 : vector<1x128xf32> to vector<8x128xf32>
    %19 = arith.subf %6, %18 : vector<8x128xf32>
    %cst_9 = arith.constant 9.99999974E-6 : f32
    %20 = vector.broadcast %cst_9 : f32 to vector<1x128xf32>
    %21 = arith.addf %17, %20 : vector<1x128xf32>
    %22 = math.rsqrt %21 : vector<1x128xf32>
    %23 = vector.broadcast %22 : vector<1x128xf32> to vector<8x128xf32>
    %24 = arith.mulf %19, %23 : vector<8x128xf32>
    %c0_10 = arith.constant 0 : index
    %c0_11 = arith.constant 0 : index
    %25 = vector.load %arg3[%c0_10, %c0_11] : memref<1x128xf32, #tpu.memory_space<vmem>>, vector<1x128xf32>
    %26 = vector.broadcast %25 : vector<1x128xf32> to vector<8x128xf32>
    %27 = arith.mulf %24, %26 : vector<8x128xf32>
    %c0_12 = arith.constant 0 : index
    %c0_13 = arith.constant 0 : index
    %28 = vector.load %arg4[%c0_12, %c0_13] : memref<1x128xf32, #tpu.memory_space<vmem>>, vector<1x128xf32>
    %29 = vector.broadcast %28 : vector<1x128xf32> to vector<8x128xf32>
    %30 = arith.addf %27, %29 : vector<8x128xf32>
    %cst_14 = arith.constant 0.000000e+00 : f32
    %31 = vector.broadcast %cst_14 : f32 to vector<8x128xf32>
    %32 = arith.maximumf %30, %31 : vector<8x128xf32>
    %33 = arith.truncf %32 : vector<8x128xf32> to vector<8x128xbf16>
    %c0_15 = arith.constant 0 : index
    %c0_16 = arith.constant 0 : index
    %34 = vector.load %arg5[%c0_15, %c0_16] : memref<128x128xbf16, #tpu.memory_space<vmem>>, vector<128x128xbf16>
    %cst_17 = arith.constant dense<0.000000e+00> : vector<8x128xf32>
    %35 = tpu.matmul %33, %34, %cst_17 {dimension_numbers = #tpu.dot_dimension_numbers<[1], [0], [0], [1], [0, 0, 1, 1], [], []>} : vector<8x128xbf16>, vector<128x128xbf16>, vector<8x128xf32> -> vector<8x128xf32>
    %c0_18 = arith.constant 0 : index
    %c0_19 = arith.constant 0 : index
    %36 = vector.load %arg6[%c0_18, %c0_19] : memref<1x128xf32, #tpu.memory_space<vmem>>, vector<1x128xf32>
    %37 = vector.broadcast %36 : vector<1x128xf32> to vector<8x128xf32>
    %38 = arith.addf %35, %37 : vector<8x128xf32>
    %cst_20 = arith.constant dense<0xFF800000> : vector<8xf32>
    %39 = vector.multi_reduction <maximumf>, %38, %cst_20 [1] : vector<8x128xf32> to vector<8xf32>
    %40 = vector.shape_cast %39 : vector<8xf32> to vector<8x1xf32>
    %41 = vector.broadcast %40 : vector<8x1xf32> to vector<8x128xf32>
    %42 = arith.subf %38, %41 : vector<8x128xf32>
    %43 = math.exp %42 : vector<8x128xf32>
    %cst_21 = arith.constant dense<0.000000e+00> : vector<8xf32>
    %44 = vector.multi_reduction <add>, %43, %cst_21 [1] : vector<8x128xf32> to vector<8xf32>
    %45 = vector.shape_cast %44 : vector<8xf32> to vector<8x1xf32>
    %46 = vector.broadcast %45 : vector<8x1xf32> to vector<8x128xf32>
    %47 = arith.divf %43, %46 : vector<8x128xf32>
    %c0_22 = arith.constant 0 : index
    %c0_23 = arith.constant 0 : index
    %48 = vector.load %arg8[%c0_22, %c0_23] : memref<8x128xf32, #tpu.memory_space<vmem>>, vector<8x128xf32>
    tpu.vector_store %arg8[%c0_22, %c0_23], %47 {strides = array<i32>} : memref<8x128xf32, #tpu.memory_space<vmem>>, vector<8x128xf32>,
    %49 = tpu.iota {dimensions = array<i32: 1>} : vector<8x128xi32>
    %c2_i32 = arith.constant 2 : i32
    %50 = vector.broadcast %c2_i32 : i32 to vector<8x128xi32>
    %51 = arith.cmpi slt, %49, %50 : vector<8x128xi32>
    %cst_24 = arith.constant -1.000000e+30 : f32
    %52 = vector.broadcast %cst_24 : f32 to vector<8x128xf32>
    %53 = arith.select %51, %47, %52 : vector<8x128xi1>, vector<8x128xf32>
    %cst_25 = arith.constant dense<0xFF800000> : vector<8xf32>
    %54 = vector.multi_reduction <maximumf>, %53, %cst_25 [1] : vector<8x128xf32> to vector<8xf32>
    %55 = vector.shape_cast %54 : vector<8xf32> to vector<8x1xf32>
    %56 = vector.broadcast %55 : vector<8x1xf32> to vector<8x128xf32>
    %57 = arith.subf %47, %56 : vector<8x128xf32>
    %58 = math.exp %57 : vector<8x128xf32>
    %cst_26 = arith.constant 0.000000e+00 : f32
    %59 = vector.broadcast %cst_26 : f32 to vector<8x128xf32>
    %60 = arith.select %51, %58, %59 : vector<8x128xi1>, vector<8x128xf32>
    %cst_27 = arith.constant dense<0.000000e+00> : vector<8xf32>
    %61 = vector.multi_reduction <add>, %60, %cst_27 [1] : vector<8x128xf32> to vector<8xf32>
    %62 = vector.shape_cast %61 : vector<8xf32> to vector<8x1xf32>
    %63 = math.log %62 : vector<8x1xf32>
    %64 = arith.addf %55, %63 : vector<8x1xf32>
    %c0_28 = arith.constant 0 : index
    %c0_29 = arith.constant 0 : index
    %65 = vector.load %arg7[%c0_28, %c0_29] : memref<8x128xf32, #tpu.memory_space<vmem>>, vector<8x128xf32>
    %66 = arith.mulf %47, %65 : vector<8x128xf32>
    %cst_30 = arith.constant dense<0.000000e+00> : vector<8xf32>
    %67 = vector.multi_reduction <add>, %66, %cst_30 [1] : vector<8x128xf32> to vector<8xf32>
    %68 = vector.shape_cast %67 : vector<8xf32> to vector<8x1xf32>
    %69 = arith.subf %64, %68 : vector<8x1xf32>
    %cst_31 = arith.constant dense<0.000000e+00> : vector<1xf32>
    %70 = vector.multi_reduction <add>, %69, %cst_31 [0] : vector<8x1xf32> to vector<1xf32>
    %71 = vector.shape_cast %70 : vector<1xf32> to vector<1x1xf32>
    %cst_32 = arith.constant 8.000000e+00 : f32
    %72 = vector.broadcast %cst_32 : f32 to vector<1x1xf32>
    %73 = arith.divf %71, %72 : vector<1x1xf32>
    %c0_33 = arith.constant 0 : index
    %c0_34 = arith.constant 0 : index
    %74 = vector.load %arg9[%c0_33, %c0_34] : memref<1x1xf32, #tpu.memory_space<vmem>>, vector<1x1xf32>
    tpu.vector_store %arg9[%c0_33, %c0_34], %73 {strides = array<i32>} : memref<1x1xf32, #tpu.memory_space<vmem>>, vector<1x1xf32>,
    return
  }
}

</mosaic_0001>

<bundles_post_ra>
// kernel: tpu_custom_call.1
= control target key start
LH: loop header
LB: loop body
LE: loop exit
PB: predicated region body
PF: predicated region fallthrough
CT: control target
= control target key end

     0   :  { %15 = vsyncpa [#allocation3], 0  ;;  %s1076_s0 = inlined_call_operand.hbm [shape: f32[8,512], index: 0, kind: input, shape index: {}]   ;;  %s1077_s1 = inlined_call_operand.hbm [shape: bf16[512,128], index: 1, kind: input, shape index: {}]   ;;  %s1078_s2 = inlined_call_operand.vmem [shape: f32[1,128], index: 2, kind: input, shape index: {}]   ;;  %s1079_s3 = inlined_call_operand.vmem [shape: f32[1,128], index: 3, kind: input, shape index: {}]   ;;  %s1080_s4 = inlined_call_operand.vmem [shape: f32[1,128], index: 4, kind: input, shape index: {}]   ;;  %s1081_s5 = inlined_call_operand.hbm [shape: bf16[128,128], index: 5, kind: input, shape index: {}]   ;;  %s1082_s6 = inlined_call_operand.vmem [shape: f32[1,128], index: 6, kind: input, shape index: {}]   ;;  %s1083_s7 = inlined_call_operand.vmem [shape: f32[8,128], index: 7, kind: input, shape index: {}]   ;;  %s1084_s8 = inlined_call_operand.hbm [shape: f32[8,128], index: 8, kind: output, shape index: {0}]   ;;  %s1085_s9 = inlined_call_operand.hbm [shape: f32[1,1], index: 9, kind: output, shape index: {1}]  }
   0x1   :  { %16 = vsyncpa [#allocation6], 0 }
   0x2   :  { %17 = vsyncpa [#allocation4], 0 }
   0x3   :  { %18 = vsyncpa [#allocation10], 0  ;;  %s936_s30 = smov [#allocation5]   ;;  %s818_s13 = scalar_lea.hbm %s1077_s1, 4096 }
   0x4   :  { %s34_s10 = sshll.u32 %s936_s30, 4  ;;  %p819_p0 = scmp.ne.s32.totalorder %s1077_s1, %s818_s13  ;;  %s35_s10 = int_to_ptr.vmem [resolvable:$true] %s34_s10 }
   0x5   :  { %p822_p1 = scmp.lt.u32.totalorder %s818_s13, %s1077_s1 }
   0x7   :  { %p824_p2 = pnand %p822_p1, %p819_p0 }
   0x9   :  { %827 = shalt.err (!%p824_p2)
}
   0xa   :  { %s828_s18 = scalar_lea.vmem %s35_s10, 4096  ;;  %p833_p4 = scmp.lt.s32.totalorder %s35_s10, %s35_s10 }
   0xb   :  { %p829_p3 = scmp.ne.s32.totalorder %s35_s10, %s828_s18  ;;  %p834_p5 = scmp.lt.s32.totalorder %s828_s18, %s828_s18 }
   0xd   :  { %p835_p6 = por %p834_p5, %p833_p4 }
   0xf   :  { %p836_p7 = pnand %p835_p6, %p829_p3 }
  0x11   :  { %839 = shalt.err (!%p836_p7)
}
  0x12   :  { %s937_s19 = smov 64   ;;  %s938_s20 = smov 4  }
  0x13   :  { %40 = dma.hbm_to_vmem [thread:$0]  %s1077_s1, 4096, %s35_s10, [#allocation6], %s937_s19, %s937_s19, %s938_s20  }
  0x14   :  { %s939_s23 = smov [#allocation2]   ;;  %s940_s25 = smov [#allocation7]  }
  0x15   :  { %s25_s24 = sshll.u32 %s939_s23, 4  ;;  %s52_s26 = sshll.u32 %s940_s25, 4  ;;  %s26_s24 = int_to_ptr.vmem [resolvable:$true] %s25_s24  ;;  %s53_s26 = int_to_ptr.vmem [resolvable:$true] %s52_s26 }
  0x16   :  { %s840_s29 = scalar_lea.hbm %s1076_s0, 512 }
  0x17   :  { %p841_p8 = scmp.ne.s32.totalorder %s1076_s0, %s840_s29  ;;  %p844_p9 = scmp.lt.u32.totalorder %s840_s29, %s1076_s0 }
  0x19   :  { %p846_p10 = pnand %p844_p9, %p841_p8 }
  0x1b   :  { %849 = shalt.err (!%p846_p10)
}
  0x1c   :  { %s850_s1 = scalar_lea.vmem %s26_s24, 512  ;;  %p855_p12 = scmp.lt.s32.totalorder %s26_s24, %s26_s24 }
  0x1d   :  { %p851_p11 = scmp.ne.s32.totalorder %s26_s24, %s850_s1  ;;  %p856_p13 = scmp.lt.s32.totalorder %s850_s1, %s850_s1 }
  0x1f   :  { %p857_p0 = por %p856_p13, %p855_p12 }
  0x21   :  { %p858_p1 = pnand %p857_p0, %p851_p11 }
  0x23   :  { %861 = shalt.err (!%p858_p1)
}
  0x24   :  { %28 = dma.hbm_to_vmem [thread:$0]  %s1076_s0, 512, %s26_s24, [#allocation3]  }
  0x25   :  { %s862_s17 = scalar_lea.hbm %s1081_s5, 1024 }
  0x26   :  { %p863_p2 = scmp.ne.s32.totalorder %s1081_s5, %s862_s17  ;;  %p866_p3 = scmp.lt.u32.totalorder %s862_s17, %s1081_s5 }
  0x28   :  { %p868_p4 = pnand %p866_p3, %p863_p2 }
  0x2a   :  { %871 = shalt.err (!%p868_p4)
}
  0x2b   :  { %s872_s25 = scalar_lea.vmem %s53_s26, 1024  ;;  %p877_p6 = scmp.lt.s32.totalorder %s53_s26, %s53_s26 }
  0x2c   :  { %p873_p5 = scmp.ne.s32.totalorder %s53_s26, %s872_s25  ;;  %p878_p7 = scmp.lt.s32.totalorder %s872_s25, %s872_s25 }
  0x2e   :  { %p879_p8 = por %p878_p7, %p877_p6 }
  0x30   :  { %p880_p9 = pnand %p879_p8, %p873_p5 }
  0x32   :  { %883 = shalt.err (!%p880_p9)
}
  0x33   :  { %58 = dma.hbm_to_vmem [thread:$0]  %s1081_s5, 1024, %s53_s26, [#allocation6], %s937_s19, %s937_s19, %s938_s20  }
  0x34   :  { %928 = dma.done.wait [#allocation3], 512  }
  0x35   :  { %929 = vsyncadd [#allocation3], 4294966784 }
  0x36   :  { %930 = dma.done.wait [#allocation6], 5120  }
  0x37   :  { %931 = vsyncadd [#allocation6], 4294962176  ;;  %v768_v0 = vld [vmem:[#allocation5 + $0x40] sm:$0xff]   ;;  %v772_v4 = vld [vmem:[#allocation5 + $0x48] sm:$0xff]   ;;  %v941_v41 = vmov 0.0   ;;  %vm942_vm0 = vmmov 0  }
  0x38   :  { %v769_v1 = vld [vmem:[#allocation5 + $0xc0] sm:$0xff]   ;;  %686 = vmatprep.subr.bf16.mxu0 %v768_v0  ;;  %v773_v5 = vld [vmem:[#allocation5 + $0xc8] sm:$0xff]   ;;  %v776_v8 = vld [vmem:[#allocation5 + $0x50] sm:$0xff]  }
  0x39   :  { %v770_v2 = vld [vmem:[#allocation5] sm:$0xff]   ;;  %708 = vmatprep.subr.bf16.mxu1 %v769_v1  ;;  %v774_v6 = vld [vmem:[#allocation5 + $0x8] sm:$0xff]   ;;  %v777_v9 = vld [vmem:[#allocation5 + $0xd0] sm:$0xff]  }
  0x3a   :  { %v771_v3 = vld [vmem:[#allocation5 + $0x80] sm:$0xff]   ;;  %687 = vmatpush3.bf16.msra.mxu0 %v770_v2  ;;  %v775_v7 = vld [vmem:[#allocation5 + $0x88] sm:$0xff]   ;;  %v778_v10 = vld [vmem:[#allocation5 + $0x10] sm:$0xff]  }
  0x3b   :  { %709 = vmatpush3.bf16.msra.mxu1 %v771_v3  ;;  %688 = vmatprep.subr.bf16.mxu0 %v772_v4  ;;  %v779_v11 = vld [vmem:[#allocation5 + $0x90] sm:$0xff]   ;;  %v780_v12 = vld [vmem:[#allocation5 + $0x58] sm:$0xff]   ;;  %v784_v16 = vld [vmem:[#allocation5 + $0x60] sm:$0xff]  }
  0x3c   :  { %710 = vmatprep.subr.bf16.mxu1 %v773_v5  ;;  %v781_v13 = vld [vmem:[#allocation5 + $0xd8] sm:$0xff]   ;;  %v785_v17 = vld [vmem:[#allocation5 + $0xe0] sm:$0xff]   ;;  %v788_v20 = vld [vmem:[#allocation5 + $0x68] sm:$0xff]  }
  0x3d   :  { %v782_v14 = vld [vmem:[#allocation5 + $0x18] sm:$0xff]   ;;  %v786_v18 = vld [vmem:[#allocation5 + $0x20] sm:$0xff]   ;;  %v789_v21 = vld [vmem:[#allocation5 + $0xe8] sm:$0xff]  }
  0x3e   :  { %689 = vmatpush3.bf16.msra.mxu0 %v774_v6  ;;  %v783_v15 = vld [vmem:[#allocation5 + $0x98] sm:$0xff]   ;;  %v787_v19 = vld [vmem:[#allocation5 + $0xa0] sm:$0xff]   ;;  %v790_v22 = vld [vmem:[#allocation5 + $0x28] sm:$0xff]  }
  0x3f   :  { %711 = vmatpush3.bf16.msra.mxu1 %v775_v7  ;;  %690 = vmatprep.subr.bf16.mxu0 %v776_v8  ;;  %v791_v23 = vld [vmem:[#allocation5 + $0xa8] sm:$0xff]   ;;  %v792_v24 = vld [vmem:[#allocation5 + $0x70] sm:$0xff]   ;;  %v796_v28 = vld [vmem:[#allocation5 + $0x78] sm:$0xff]  }
  0x40   :  { %712 = vmatprep.subr.bf16.mxu1 %v777_v9  ;;  %v793_v25 = vld [vmem:[#allocation5 + $0xf0] sm:$0xff]   ;;  %v797_v29 = vld [vmem:[#allocation5 + $0xf8] sm:$0xff]   ;;  %v74_v32 = vld [vmem:[#allocation2 + $0x8] sm:$0xff] }
  0x41   :  { %v794_v26 = vld [vmem:[#allocation5 + $0x30] sm:$0xff]   ;;  %v798_v30 = vld [vmem:[#allocation5 + $0x38] sm:$0xff]   ;;  %v73_v34 = vld [vmem:[#allocation2] sm:$0xff]  ;;  %v78_v35 = vpack.c.bf16 %v74_v32, %v74_v32 }
  0x42   :  { %691 = vmatpush3.bf16.msra.mxu0 %v778_v10  ;;  %v795_v27 = vld [vmem:[#allocation5 + $0xb0] sm:$0xff]   ;;  %v799_v31 = vld [vmem:[#allocation5 + $0xb8] sm:$0xff]   ;;  %v77_v37 = vpack.c.bf16 %v73_v34, %v73_v34  ;;  %v800_v40 = vld [vmem:[#allocation7] sm:$0xff]   ;;  %v583_v34 = vlaneseq }
  0x43   :  { %713 = vmatpush3.bf16.msra.mxu1 %v779_v11  ;;  %692 = vmatprep.subr.bf16.mxu0 %v780_v12  ;;  %v76_v33 = vld [vmem:[#allocation2 + $0x18] sm:$0xff]  ;;  %v75_v38 = vld [vmem:[#allocation2 + $0x10] sm:$0xff]  ;;  %v801_v42 = vld [vmem:[#allocation7 + $0x8] sm:$0xff]  }
  0x44   :  { %714 = vmatprep.subr.bf16.mxu1 %v781_v13  ;;  %v80_v36 = vpack.c.bf16 %v76_v33, %v76_v33  ;;  %v79_v39 = vpack.c.bf16 %v75_v38, %v75_v38  ;;  %376 = vmatprep.mubr.bf16.mxu0 %v78_v35  ;;  %v802_v43 = vld [vmem:[#allocation7 + $0x10] sm:$0xff]   ;;  %v803_v44 = vld [vmem:[#allocation7 + $0x18] sm:$0xff]   ;;  %v804_v45 = vld [vmem:[#allocation7 + $0x20] sm:$0xff]   ;;  %v584_v35 = vand.u32 127, %v583_v34 }
  0x45   :  { %v805_v46 = vld [vmem:[#allocation7 + $0x28] sm:$0xff]   ;;  %v806_v47 = vld [vmem:[#allocation7 + $0x30] sm:$0xff]   ;;  %v807_v48 = vld [vmem:[#allocation7 + $0x38] sm:$0xff]  }
  0x46   :  { %693 = vmatpush3.bf16.msra.mxu0 %v782_v14  ;;  %416 = vmatprep.mubr.bf16.mxu1 %v80_v36  ;;  %v642_v51 = vld [vmem:[%s1078_s2] ss:$0 sm:$0xff]  ;;  %vm585_vm1 = vcmp.lt.s32.totalorder %v584_v35, 2 }
  0x47   :  { %715 = vmatpush3.bf16.msra.mxu1 %v783_v15  ;;  %694 = vmatprep.subr.bf16.mxu0 %v784_v16  ;;  %v675_v16 = vld [vmem:[%s1079_s3] ss:$0 sm:$0xff] }
  0x48   :  { %716 = vmatprep.subr.bf16.mxu1 %v785_v17 }
  0x4a   :  { %695 = vmatpush3.bf16.msra.mxu0 %v786_v18  ;;  %v676_v18 = vld [vmem:[%s1080_s4] ss:$0 sm:$0xff] }
  0x4b   :  { %717 = vmatpush3.bf16.msra.mxu1 %v787_v19  ;;  %696 = vmatprep.subr.bf16.mxu0 %v788_v20 }
  0x4c   :  { %718 = vmatprep.subr.bf16.mxu1 %v789_v21 }
  0x4e   :  { %697 = vmatpush3.bf16.msra.mxu0 %v790_v22 }
  0x4f   :  { %719 = vmatpush3.bf16.msra.mxu1 %v791_v23  ;;  %698 = vmatprep.subr.bf16.mxu0 %v792_v24  ;;  %v677_v23 = vld [vmem:[%s1082_s6] ss:$0 sm:$0xff]  ;;  %s943_s6 = smov [#allocation8]  }
  0x50   :  { %720 = vmatprep.subr.bf16.mxu1 %v793_v25  ;;  %s618_s30 = sshll.u32 %s943_s6, 4  ;;  %s619_s30 = int_to_ptr.vmem [resolvable:$true] %s618_s30 }
  0x51   :  { %s884_s11 = scalar_lea.vmem %s619_s30, 128  ;;  %p889_p11 = scmp.lt.s32.totalorder %s619_s30, %s619_s30 }
  0x52   :  { %699 = vmatpush3.bf16.msra.mxu0 %v794_v26  ;;  %p885_p10 = scmp.ne.s32.totalorder %s619_s30, %s884_s11  ;;  %p890_p12 = scmp.lt.s32.totalorder %s884_s11, %s884_s11 }
  0x53   :  { %721 = vmatpush3.bf16.msra.mxu1 %v795_v27  ;;  %700 = vmatprep.subr.bf16.mxu0 %v796_v28 }
  0x54   :  { %722 = vmatprep.subr.bf16.mxu1 %v797_v29  ;;  %p891_p13 = por %p890_p12, %p889_p11 }
  0x56   :  { %701 = vmatpush3.bf16.msra.mxu0 %v798_v30  ;;  %p892_p0 = pnand %p891_p13, %p885_p10 }
  0x57   :  { %723 = vmatpush3.bf16.msra.mxu1 %v799_v31  ;;  %739 = vmatprep.subr.bf16.mxu0 %v941_v41 }
  0x59   :  { %377 = vmatmul.mubr.bf16.vlgmr.msra.gmra.mrb[0].mxu0 %v77_v37  ;;  %v598_v37 = vld [vmem:[%s1083_s7] sm:$0xff] }
  0x5a   :  { %417 = vmatmul.mubr.bf16.vlgmr.msra.gmra.mrb[0].mxu1 %v79_v39  ;;  %740 = vmatpush3.bf16.msra.mxu0 %v800_v40 }
  0x5b   :  { %741 = vmatprep.subr.bf16.mxu0 %v941_v41  ;;  %755 = vmatprep.mubr.msk.bf16.mxu0 %vm942_vm0, %v941_v41 }
  0x5e   :  { %742 = vmatpush3.bf16.msra.mxu0 %v801_v42 }
  0x5f   :  { %743 = vmatprep.subr.bf16.mxu0 %v941_v41 }
  0x62   :  { %744 = vmatpush3.bf16.msra.mxu0 %v802_v43 }
  0x63   :  { %745 = vmatprep.subr.bf16.mxu0 %v941_v41 }
  0x66   :  { %746 = vmatpush3.bf16.msra.mxu0 %v803_v44 }
  0x67   :  { %747 = vmatprep.subr.bf16.mxu0 %v941_v41 }
  0x6a   :  { %748 = vmatpush3.bf16.msra.mxu0 %v804_v45 }
  0x6b   :  { %749 = vmatprep.subr.bf16.mxu0 %v941_v41 }
  0x6e   :  { %750 = vmatpush3.bf16.msra.mxu0 %v805_v46 }
  0x6f   :  { %751 = vmatprep.subr.bf16.mxu0 %v941_v41 }
  0x72   :  { %752 = vmatpush3.bf16.msra.mxu0 %v806_v47 }
  0x73   :  { %753 = vmatprep.subr.bf16.mxu0 %v941_v41 }
  0x76   :  { %754 = vmatpush3.bf16.msra.mxu0 %v807_v48 }
 0x12c   :  { %v702_v49 = vpop.f32.mrb[0].mxu0 }
 0x12d   :  { %v724_v50 = vpop.f32.mrb[0].mxu1  ;;  %v703_v52 = vpop.f32.mrb[1].mxu0 }
 0x12e   :  { %v725_v53 = vpop.f32.mrb[1].mxu1  ;;  %v704_v54 = vadd.f32 %v703_v52, %v702_v49  ;;  %v705_v56 = vpop.f32.mrb[2].mxu0 }
 0x12f   :  { %v726_v55 = vadd.f32 %v725_v53, %v724_v50  ;;  %v727_v57 = vpop.f32.mrb[2].mxu1  ;;  %v706_v58 = vpop.f32.mrb[3].mxu0 }
 0x130   :  { %v728_v59 = vpop.f32.mrb[3].mxu1  ;;  %v379_v60 = vadd.f32 %v704_v54, %v642_v51 }
 0x132   :  { %v419_v61 = vadd.f32 %v726_v55, %v379_v60 }
 0x134   :  { %v424_v62 = vrot.slane %v419_v61, 4 }
 0x136   :  { %v425_v63 = vadd.f32 %v424_v62, %v419_v61 }
 0x138   :  { %v426_v0 = vrot.slane %v425_v63, 2 }
 0x13a   :  { %v427_v1 = vadd.f32 %v426_v0, %v425_v63 }
 0x13c   :  { %v428_v2 = vrot.slane %v427_v1, 1 }
 0x13e   :  { %v429_v3 = vadd.f32 %v428_v2, %v427_v1 }
 0x140   :  { %v431_v4 = vmul.f32 0.125, %v429_v3 }
 0x142   :  { %v432_v5 = vsub.f32 %v419_v61, %v431_v4 }
 0x144   :  { %v433_v6 = vmul.f32 %v432_v5, %v432_v5 }
 0x146   :  { %v434_v7 = vrot.slane %v433_v6, 4 }
 0x148   :  { %v435_v8 = vadd.f32 %v434_v7, %v433_v6 }
 0x14a   :  { %v436_v9 = vrot.slane %v435_v8, 2 }
 0x14c   :  { %v437_v10 = vadd.f32 %v436_v9, %v435_v8 }
 0x14e   :  { %v438_v11 = vrot.slane %v437_v10, 1 }
 0x150   :  { %v439_v12 = vadd.f32 %v438_v11, %v437_v10 }
 0x152   :  { %v440_v13 = vmul.f32 0.125, %v439_v12 }
 0x154   :  { %v441_v14 = vadd.f32 1e-05, %v440_v13 }
 0x156   :  { %808 = vrsqrt.f32 %v441_v14 }
 0x160   :  { %v809_v15 = vpop.eup %808 }
 0x161   :  { %v443_v17 = vmul.f32 %v809_v15, %v432_v5 }
 0x163   :  { %v451_v19 = vmul.f32 %v675_v16, %v443_v17 }
 0x165   :  { %v459_v20 = vadd.f32 %v676_v18, %v451_v19 }
 0x167   :  { %v460_v21 = vmax.f32 %v459_v20, 0.0 }
 0x169   :  { %v461_v22 = vpack.c.bf16 %v460_v21, %v460_v21 }
 0x16b   :  { %756 = vmatmul.mubr.bf16.vlgmr.msra.gmra.mrb[4].mxu0 %v461_v22 }
 0x23e   :  { %v567_v24 = vpop.f32.mrb[4].mxu0 }
 0x23f   :  { %v568_v25 = vadd.f32 %v677_v23, %v567_v24  ;;  %v757_v26 = vpop.f32.mrb[5].mxu0 }
 0x240   :  { %v570_v27 = vpop.f32.mrb[6].mxu0 }
 0x241   :  { %573 = vmax.xlane.f32.xlu0 %v568_v25  ;;  %v758_v28 = vpop.f32.mrb[7].mxu0 }
 0x2ce   :  { %v574_v29 = vpop.xlane.xlu0 %573 }
 0x2cf   :  { %v575_v30 = vsub.f32 %v568_v25, %v574_v29 }
 0x2d1   :  { %v576_v31 = vmul.f32 1.442695, %v575_v30 }
 0x2d3   :  { %810 = vpow2.f32 %v576_v31 }
 0x2dd   :  { %v811_v32 = vpop.eup %810 }
 0x2de   :  { %578 = vadd.xlane.f32.xlu0 %v811_v32 }
 0x36b   :  { %v579_v33 = vpop.xlane.xlu0 %578 }
 0x36c   :  { %812 = vrcp.f32 %v579_v33 }
 0x376   :  { %v813_v36 = vpop.eup %812 }
 0x377   :  { %v581_v38 = vmul.f32 %v813_v36, %v811_v32 }
 0x379   :  { %v586_v39 = vsel %vm585_vm1, %v581_v38, -1e+30  ;;  %582 = vst [vmem:[#allocation8] sm:$0xff] %v581_v38  ;;  %v599_v40 = vmul.f32 %v598_v37, %v581_v38 }
 0x37a   :  { %587 = vmax.xlane.f32.xlu1 %v586_v39 }
 0x37b   :  { %600 = vadd.xlane.f32.xlu0 %v599_v40 }
 0x407   :  { %v588_v41 = vpop.xlane.xlu1 %587 }
 0x408   :  { %v589_v42 = vsub.f32 %v581_v38, %v588_v41 }
 0x40a   :  { %v590_v43 = vmul.f32 1.442695, %v589_v42 }
 0x40c   :  { %814 = vpow2.f32 %v590_v43 }
 0x416   :  { %v815_v44 = vpop.eup %814 }
 0x417   :  { %v592_v45 = vsel %vm585_vm1, %v815_v44, 0.0 }
 0x418   :  { %593 = vadd.xlane.f32.xlu1 %v592_v45 }
 0x419   :  { %895 = shalt.err (!%p892_p0)
}
 0x41a   :  { %s896_s13 = scalar_lea.hbm %s1084_s8, 128 }
 0x41b   :  { %p897_p1 = scmp.ne.s32.totalorder %s1084_s8, %s896_s13  ;;  %p900_p2 = scmp.lt.u32.totalorder %s896_s13, %s1084_s8 }
 0x41d   :  { %p902_p3 = pnand %p900_p2, %p897_p1 }
 0x41f   :  { %905 = shalt.err (!%p902_p3)
}
 0x420   :  { %621 = dma.vmem_to_hbm [thread:$0]  %s619_s30, 128, %s1084_s8, [#allocation4]   ;;  %v601_v50 = vpop.xlane.xlu0 %600  ;;  %vm610_vm2 = vcmask 0  }
 0x421   :  { %s944_s18 = smov [#allocation9]  }
 0x422   :  { %s628_s21 = sshll.u32 %s944_s18, 4  ;;  %s629_s21 = int_to_ptr.vmem [resolvable:$true] %s628_s21 }
 0x423   :  { %s906_s8 = scalar_lea.vmem %s629_s21, 16  ;;  %s910_s22 = scalar_lea.vmem %s629_s21, 32 }
 0x424   :  { %p907_p4 = scmp.ne.s32.totalorder %s629_s21, %s906_s8  ;;  %p911_p5 = scmp.lt.s32.totalorder %s629_s21, %s629_s21 }
 0x425   :  { %p912_p6 = scmp.lt.s32.totalorder %s910_s22, %s906_s8 }
 0x427   :  { %p913_p7 = por %p912_p6, %p911_p5 }
 0x429   :  { %p914_p8 = pnand %p913_p7, %p907_p4 }
 0x4a5   :  { %v594_v46 = vpop.xlane.xlu1 %593 }
 0x4a6   :  { %816 = vlog2.f32 %v594_v46 }
 0x4b0   :  { %v817_v47 = vpop.eup %816 }
 0x4b1   :  { %v596_v48 = vmul.f32 0.6931472, %v817_v47 }
 0x4b3   :  { %v597_v49 = vadd.f32 %v596_v48, %v588_v41 }
 0x4b5   :  { %v602_v51 = vsub.f32 %v597_v49, %v601_v50 }
 0x4b7   :  { %v603_v52 = vrot.slane %v602_v51, 4 }
 0x4b9   :  { %v604_v53 = vadd.f32 %v603_v52, %v602_v51 }
 0x4bb   :  { %v605_v54 = vrot.slane %v604_v53, 2 }
 0x4bd   :  { %v606_v55 = vadd.f32 %v605_v54, %v604_v53 }
 0x4bf   :  { %v607_v56 = vrot.slane %v606_v55, 1 }
 0x4c1   :  { %v608_v57 = vadd.f32 %v607_v56, %v606_v55 }
 0x4c3   :  { %v609_v58 = vmul.f32 0.125, %v608_v57 }
 0x4c5   :  { %611 = vst.msk [vmem:[#allocation9] sm:$0x1] %vm610_vm2, %v609_v58 }
 0x4c6   :  { %917 = shalt.err (!%p914_p8)
}
 0x4c7   :  { %s918_s0 = scalar_lea.hbm %s1085_s9, 16 }
 0x4c8   :  { %p919_p9 = scmp.ne.s32.totalorder %s1085_s9, %s918_s0  ;;  %p922_p10 = scmp.lt.u32.totalorder %s918_s0, %s1085_s9 }
 0x4ca   :  { %p924_p11 = pnand %p922_p10, %p919_p9 }
 0x4cc   :  { %927 = shalt.err (!%p924_p11)
}
 0x4cd   :  { %631 = dma.vmem_to_hbm [thread:$0]  %s629_s21, 16, %s1085_s9, [#allocation10]  }
 0x4ce   :  { %932 = dma.done.wait [#allocation4], 128  }
 0x4cf   :  { %933 = vsyncadd [#allocation4], 4294967168 }
 0x4d0   :  { %934 = dma.done.wait [#allocation10], 16  }
 0x4d1   :  { %935 = vsyncadd [#allocation10], 4294967280 }
 0x4d2   :  { %638 = vsyncpa [#allocation3], 1 }
 0x4d3   :  { %639 = vsyncpa [#allocation6], 1 }
 0x4d4   :  { %640 = vsyncpa [#allocation4], 1 }
 0x4d5   :  { %641 = vsyncpa [#allocation10], 1 }

</bundles_post_ra>
